<compile_context>
chip_gen: v5e
topology: v5e:2x2
jax: 0.10.0
libtpu: 0.0.40
codegen_flags: <defaults>
</compile_context>

<pallas_src>
import numpy as np
import jax
import jax.numpy as jnp
from jax.experimental import pallas as pl
from jax.experimental.pallas import tpu as pltpu


# ---------------------------------------------------------------------------
# Deterministic parameter construction (replaces transition('legs', N) +
# scipy.signal.cont2discrete(..., method='bilinear') from the module __init__).
# ---------------------------------------------------------------------------
def hippo_legs_transition(N):
    q = np.arange(N, dtype=np.float64)
    col, row = np.meshgrid(q, q)
    r = 2 * q + 1
    M = -(np.where(row >= col, r, 0) - np.diag(q))
    T = np.sqrt(np.diag(2 * q + 1))
    A = T @ M @ np.linalg.inv(T)          # A[i,j] = -sqrt(2i+1)sqrt(2j+1) (i>j), -(i+1) (i==j), 0 (i<j)
    B = np.diag(T)[:, None]               # B[i] = sqrt(2i+1)
    return A, B


def bilinear_discretize(A, B, dt):
    # scipy cont2discrete 'bilinear' (Tustin), alpha = 0.5
    N = A.shape[0]
    I = np.eye(N)
    M0 = I - (dt / 2.0) * A
    Ad = np.linalg.solve(M0, I + (dt / 2.0) * A)
    Bd = np.linalg.solve(M0, dt * B)
    return Ad, Bd


# TODO(synk): eval_matrix / reconstruct() are not part of forward(); not implemented here.


def build_lifted_mats(Ad, Bd, T_L):
    """Host-side (float64) constants that lift T_L recurrence steps into two matmuls.

    For a chunk starting from state c0 with input slab U of shape (M, T_L):
        c_k = c0 @ (A^T)^(k+1) + sum_{j<=k} U[:, j] * (B_d @ (A^T)^(k-j))
            = (c0 @ P + U @ G)[:, k*N:(k+1)*N]
    """
    N = Ad.shape[0]
    At = np.asarray(Ad, dtype=np.float64).T
    Bv = np.asarray(Bd, dtype=np.float64).reshape(N)
    pows = [np.eye(N, dtype=np.float64)]
    for _ in range(T_L):
        pows.append(pows[-1] @ At)
    P = np.concatenate([pows[k + 1] for k in range(T_L)], axis=1)       # (N, T_L*N)
    G = np.zeros((T_L, T_L * N), dtype=np.float64)                      # (T_L, T_L*N)
    for k in range(T_L):
        for j in range(k + 1):
            G[j, k * N:(k + 1) * N] = Bv @ pows[k - j]
    return P.astype(np.float32), G.astype(np.float32)


# ---------------------------------------------------------------------------
# Pallas kernel: one grid step per (m-tile, chunk); lifted recurrence inside.
# ---------------------------------------------------------------------------
def hippo_chunk_kernel(x_ref, P_ref, G_ref, out_ref, c_ref):
    # x_ref  : (m_tile, T_L)     input slab for this chunk (timesteps on lanes)
    # P_ref  : (N, T_L*N)        stacked powers of A^T (resident)
    # G_ref  : (T_L, T_L*N)      stacked B_d @ (A^T)^p, causal-in-time (resident)
    # out_ref: (m_tile, T_L*N)   all T_L states of this chunk, lane-dense
    # c_ref  : (m_tile, N)       persistent carried state across chunks
    @pl.when(pl.program_id(1) == 0)
    def _():
        c_ref[...] = jnp.zeros_like(c_ref)

    out = (jnp.dot(c_ref[...], P_ref[...], preferred_element_type=jnp.float32)
           + jnp.dot(x_ref[...], G_ref[...], preferred_element_type=jnp.float32))
    out_ref[...] = out.astype(out_ref.dtype)
    n = c_ref.shape[-1]
    c_ref[...] = out[:, out.shape[-1] - n:]          # carry c_{last} into next chunk


def hippo_legt_forward(inputs, Ad, Bd, chunk=64):
    """inputs: (B, C, L) float32 -> (L, B, C, N) float32."""
    Bsz, C, L = inputs.shape
    N = Ad.shape[0]
    M = Bsz * C

    T_L = int(min(chunk, L))
    L_pad = ((L + T_L - 1) // T_L) * T_L
    num_chunks = L_pad // T_L

    # Batch tiling: lets the "parallel" grid axis shard across TensorCores on v7x.
    if M > 256 and M % 256 == 0:
        m_tile = 256
    else:
        m_tile = M
    num_m_tiles = M // m_tile

    x = inputs.reshape(M, L).astype(jnp.float32)
    if L_pad != L:
        x = jnp.pad(x, ((0, 0), (0, L_pad - L)))      # padded steps are sliced off below
    # (num_chunks, M, T_L): lane-dense per-chunk input slabs
    x_chunks = jnp.transpose(x.reshape(M, num_chunks, T_L), (1, 0, 2))

    P_np, G_np = build_lifted_mats(Ad, Bd, T_L)
    P = jnp.asarray(P_np)
    G = jnp.asarray(G_np)

    out = pl.pallas_call(
        hippo_chunk_kernel,
        out_shape=jax.ShapeDtypeStruct((num_chunks, M, T_L * N), jnp.float32),
        grid_spec=pltpu.PrefetchScalarGridSpec(
            num_scalar_prefetch=0,
            grid=(num_m_tiles, num_chunks),
            in_specs=[
                pl.BlockSpec((None, m_tile, T_L), lambda m, t: (t, m, 0)),  # x slab
                pl.BlockSpec((N, T_L * N), lambda m, t: (0, 0)),            # P (resident)
                pl.BlockSpec((T_L, T_L * N), lambda m, t: (0, 0)),          # G (resident)
            ],
            out_specs=pl.BlockSpec((None, m_tile, T_L * N), lambda m, t: (t, m, 0)),
            scratch_shapes=[pltpu.VMEM((m_tile, N), jnp.float32)],
        ),
        compiler_params=pltpu.CompilerParams(
            dimension_semantics=("parallel", "arbitrary")),   # batch parallel, chunks sequential
    )(x_chunks, P, G)

    # (num_chunks, M, T_L*N) -> (L, B, C, N)   (layout plumbing outside the kernel)
    out = out.reshape(num_chunks, M, T_L, N)
    out = jnp.transpose(out, (0, 2, 1, 3)).reshape(L_pad, M, N)
    if L_pad != L:
        out = out[:L]
    return out.reshape(L, Bsz, C, N)


# ---------------------------------------------------------------------------
# Pure-JAX reference (mirrors the PyTorch loop) for correctness checking.
# ---------------------------------------------------------------------------
def hippo_legt_ref(inputs, Ad, Bd):
    Bsz, C, L = inputs.shape
    N = Ad.shape[0]
    A = jnp.asarray(Ad, jnp.float32)
    Bv = jnp.asarray(np.reshape(Bd, (N,)), jnp.float32)
    c0 = jnp.zeros((Bsz, C, N), jnp.float32)

    def step(c, f):                        # f: (Bsz, C)
        c = c @ A.T + f[..., None] * Bv
        return c, c

    fs = jnp.transpose(inputs, (2, 0, 1))  # (L, Bsz, C)
    _, cs = jax.lax.scan(step, c0, fs)
    return cs                              # (L, Bsz, C, N)


if __name__ == "__main__":
    B_, C_, L_, N_ = 2, 4, 16, 32
    key = jax.random.PRNGKey(0)
    x = jax.random.normal(key, (B_, C_, L_), dtype=jnp.float32)

    A_cont, B_cont = hippo_legs_transition(N_)
    Ad, Bd = bilinear_discretize(A_cont, B_cont, dt=1.0)   # module default dt=1.0
    Bd = Bd.squeeze(-1)

    out = hippo_legt_forward(x, Ad, Bd, chunk=64)
    out = jax.block_until_ready(out)

    ref = hippo_legt_ref(x, Ad, Bd)
    assert out.shape == (L_, B_, C_, N_), out.shape
    np.testing.assert_allclose(np.asarray(out), np.asarray(ref), rtol=1e-3, atol=1e-3)
    print("KERNEL_OK")
</pallas_src>

<mosaic_0001>
module attributes {stable_mosaic.version = 11 : i64} {
  func.func @hippo_chunk_kernel(%arg0: i32, %arg1: i32, %arg2: memref<1x8x16xf32, #tpu.memory_space<vmem>>, %arg3: memref<32x512xf32, #tpu.memory_space<vmem>>, %arg4: memref<16x512xf32, #tpu.memory_space<vmem>>, %arg5: memref<1x8x512xf32, #tpu.memory_space<vmem>>, %arg6: memref<8x32xf32, #tpu.memory_space<vmem>>) attributes {dimension_semantics = [#tpu.dimension_semantics<parallel>, #tpu.dimension_semantics<arbitrary>], iteration_bounds = array<i64: 1, 1>, scalar_prefetch = 0 : i64, scratch_operands = 1 : i64, tpu.core_type = #tpu.core_type<tc>, window_params = [{transform_indices = @transform_0, window_bounds = array<i64: 1, 8, 16>}, {pipeline_mode = #tpu.pipeline_mode<synchronous>, transform_indices = @transform_1, window_bounds = array<i64: 32, 512>}, {pipeline_mode = #tpu.pipeline_mode<synchronous>, transform_indices = @transform_2, window_bounds = array<i64: 16, 512>}, {transform_indices = @transform_3, window_bounds = array<i64: 1, 8, 512>}]} {
    %c0_i32 = arith.constant 0 : i32
    %0 = arith.cmpi eq, %arg1, %c0_i32 : i32
    %1 = arith.extui %0 : i1 to i32
    %c0_i32_0 = arith.constant 0 : i32
    %2 = arith.cmpi ne, %1, %c0_i32_0 : i32
    scf.if %2 {
      %cst_15 = arith.constant 0.000000e+00 : f32
      %16 = vector.broadcast %cst_15 : f32 to vector<8x32xf32>
      %c0_16 = arith.constant 0 : index
      %c0_17 = arith.constant 0 : index
      %17 = vector.load %arg6[%c0_16, %c0_17] : memref<8x32xf32, #tpu.memory_space<vmem>>, vector<8x32xf32>
      tpu.vector_store %arg6[%c0_16, %c0_17], %16 {strides = array<i32>} : memref<8x32xf32, #tpu.memory_space<vmem>>, vector<8x32xf32>,
    } else {
    }
    %c0 = arith.constant 0 : index
    %c0_1 = arith.constant 0 : index
    %3 = vector.load %arg6[%c0, %c0_1] : memref<8x32xf32, #tpu.memory_space<vmem>>, vector<8x32xf32>
    %c0_2 = arith.constant 0 : index
    %c0_3 = arith.constant 0 : index
    %4 = vector.load %arg3[%c0_2, %c0_3] : memref<32x512xf32, #tpu.memory_space<vmem>>, vector<32x512xf32>
    %cst = arith.constant dense<0.000000e+00> : vector<8x512xf32>
    %5 = tpu.matmul %3, %4, %cst {dimension_numbers = #tpu.dot_dimension_numbers<[1], [0], [0], [1], [0, 0, 1, 1], [], []>} : vector<8x32xf32>, vector<32x512xf32>, vector<8x512xf32> -> vector<8x512xf32>
    %c0_4 = arith.constant 0 : index
    %c0_5 = arith.constant 0 : index
    %c0_6 = arith.constant 0 : index
    %6 = vector.load %arg2[%c0_4, %c0_5, %c0_6] : memref<1x8x16xf32, #tpu.memory_space<vmem>>, vector<1x8x16xf32>
    %7 = vector.shape_cast %6 : vector<1x8x16xf32> to vector<8x16xf32>
    %c0_7 = arith.constant 0 : index
    %c0_8 = arith.constant 0 : index
    %8 = vector.load %arg4[%c0_7, %c0_8] : memref<16x512xf32, #tpu.memory_space<vmem>>, vector<16x512xf32>
    %cst_9 = arith.constant dense<0.000000e+00> : vector<8x512xf32>
    %9 = tpu.matmul %7, %8, %cst_9 {dimension_numbers = #tpu.dot_dimension_numbers<[1], [0], [0], [1], [0, 0, 1, 1], [], []>} : vector<8x16xf32>, vector<16x512xf32>, vector<8x512xf32> -> vector<8x512xf32>
    %10 = arith.addf %5, %9 : vector<8x512xf32>
    %c0_10 = arith.constant 0 : index
    %c0_11 = arith.constant 0 : index
    %c0_12 = arith.constant 0 : index
    %11 = vector.load %arg5[%c0_10, %c0_11, %c0_12] : memref<1x8x512xf32, #tpu.memory_space<vmem>>, vector<1x8x512xf32>
    %12 = vector.shape_cast %11 : vector<1x8x512xf32> to vector<8x512xf32>
    %13 = vector.shape_cast %10 : vector<8x512xf32> to vector<1x8x512xf32>
    tpu.vector_store %arg5[%c0_10, %c0_11, %c0_12], %13 {strides = array<i32>} : memref<1x8x512xf32, #tpu.memory_space<vmem>>, vector<1x8x512xf32>,
    %14 = vector.extract_strided_slice %10 {offsets = [0, 480], sizes = [8, 32], strides = [1, 1]} : vector<8x512xf32> to vector<8x32xf32>
    %c0_13 = arith.constant 0 : index
    %c0_14 = arith.constant 0 : index
    %15 = vector.load %arg6[%c0_13, %c0_14] : memref<8x32xf32, #tpu.memory_space<vmem>>, vector<8x32xf32>
    tpu.vector_store %arg6[%c0_13, %c0_14], %14 {strides = array<i32>} : memref<8x32xf32, #tpu.memory_space<vmem>>, vector<8x32xf32>,
    return
  }
  func.func @transform_0(%arg0: i32, %arg1: i32) -> (i32, i32, i32) {
    %c0_i32 = arith.constant 0 : i32
    %c0_i32_0 = arith.constant 0 : i32
    return %arg1, %arg0, %c0_i32 : i32, i32, i32
  }
  func.func @transform_1(%arg0: i32, %arg1: i32) -> (i32, i32) {
    %c0_i32 = arith.constant 0 : i32
    %c0_i32_0 = arith.constant 0 : i32
    %c0_i32_1 = arith.constant 0 : i32
    return %c0_i32, %c0_i32_0 : i32, i32
  }
  func.func @transform_2(%arg0: i32, %arg1: i32) -> (i32, i32) {
    %c0_i32 = arith.constant 0 : i32
    %c0_i32_0 = arith.constant 0 : i32
    %c0_i32_1 = arith.constant 0 : i32
    return %c0_i32, %c0_i32_0 : i32, i32
  }
  func.func @transform_3(%arg0: i32, %arg1: i32) -> (i32, i32, i32) {
    %c0_i32 = arith.constant 0 : i32
    %c0_i32_0 = arith.constant 0 : i32
    return %arg1, %arg0, %c0_i32 : i32, i32, i32
  }
}

</mosaic_0001>

<bundles_post_ra>
// kernel: tpu_custom_call.1
= control target key start
LH: loop header
LB: loop body
LE: loop exit
PB: predicated region body
PF: predicated region fallthrough
CT: control target
= control target key end

     0   :  { %8 = vsyncpa [#allocation4], 0  ;;  %s456_s0 = inlined_call_operand.hbm [shape: f32[1,8,16], index: 0, kind: input, shape index: {}]   ;;  %s457_s1 = inlined_call_operand.hbm [shape: f32[32,512], index: 1, kind: input, shape index: {}]   ;;  %s458_s2 = inlined_call_operand.hbm [shape: f32[16,512], index: 2, kind: input, shape index: {}]   ;;  %s459_s3 = inlined_call_operand.hbm [shape: f32[1,8,512], index: 3, kind: output, shape index: {}]  }
   0x1   :  { %9 = vsyncpa [#allocation7], 0  ;;  %s26_s14 = sshll.u32 %s457_s1, 4  ;;  %s27_s14 = int_to_ptr.hbm [resolvable:$true] %s26_s14 }
   0x2   :  { %10 = vsyncpa [#allocation5], 0  ;;  %s404_s15 = smov [#allocation6]   ;;  %s16_s19 = sshll.u32 %s456_s0, 4  ;;  %s17_s19 = int_to_ptr.hbm [resolvable:$true] %s16_s19 }
   0x3   :  { %s28_s16 = sshll.u32 %s404_s15, 4  ;;  %s405_s20 = smov 512   ;;  %s29_s16 = int_to_ptr.vmem [resolvable:$true] %s28_s16 }
   0x4   :  { %s406_s21 = smov 32   ;;  %s407_s22 = smov [#allocation3]  }
   0x5   :  { %34 = dma.hbm_to_vmem [thread:$0]  %s27_s14, 2048, %s29_s16, [#allocation7], %s405_s20, %s405_s20, %s406_s21  }
   0x6   :  { %s18_s23 = sshll.u32 %s407_s22, 4  ;;  %s39_s1 = sshll.u32 %s458_s2, 4  ;;  %s19_s23 = int_to_ptr.vmem [resolvable:$true] %s18_s23  ;;  %s40_s1 = int_to_ptr.hbm [resolvable:$true] %s39_s1 }
   0x7   :  { %21 = dma.hbm_to_vmem [thread:$0]  %s17_s19, 128, %s19_s23, [#allocation4]  }
   0x8   :  { %s408_s26 = smov [#allocation8]  }
   0x9   :  { %s41_s27 = sshll.u32 %s408_s26, 4  ;;  %s42_s27 = int_to_ptr.vmem [resolvable:$true] %s41_s27 }
   0xa   :  { %47 = dma.hbm_to_vmem [thread:$0]  %s40_s1, 1024, %s42_s27, [#allocation7], %s405_s20, %s405_s20, %s406_s21  }
   0xb   :  { %398 = dma.done.wait [#allocation4], 128  }
   0xc   :  { %399 = vsyncadd [#allocation4], 4294967168 }
   0xd   :  { %400 = dma.done.wait [#allocation7], 3072  }
   0xe   :  { %401 = vsyncadd [#allocation7], 4294964224  ;;  %vm64_vm0 = vcmask 261120   ;;  %v409_v0 = vmov 0.0   ;;  %v91_v1 = vld [vmem:[#allocation8 + $0x38] sm:$0xff]  ;;  %vm92_vm1 = vcmask 130048  }
   0xf   :  { %65 = vst.msk [vmem:[#allocation2] sm:$0xff] %vm64_vm0, %v409_v0  ;;  %v87_v2 = vld [vmem:[#allocation8 + $0x18] sm:$0xff]  ;;  %170 = vmatpush.msra.mxu3 %v91_v1  ;;  %v90_v5 = vld [vmem:[#allocation8 + $0x30] sm:$0xff]  ;;  %v88_v7 = vld [vmem:[#allocation8 + $0x20] sm:$0xff]  ;;  %s410_s0 = smov [#allocation9]   ;;  %s276_s30 = sshll.u32 %s459_s3, 4  ;;  %s277_s30 = int_to_ptr.hbm [resolvable:$true] %s276_s30 }
  0x10   :  { %v83_v3 = vld [vmem:[#allocation3] sm:$0xff]  ;;  %150 = vmatpush.msra.mxu2 %v90_v5  ;;  %v86_v6 = vld [vmem:[#allocation8 + $0x10] sm:$0xff]  ;;  %110 = vmatpush.msra.mxu0 %v88_v7  ;;  %v89_v10 = vld [vmem:[#allocation8 + $0x28] sm:$0xff]  ;;  %s274_s2 = sshll.u32 %s410_s0, 4  ;;  %s275_s2 = int_to_ptr.vmem [resolvable:$true] %s274_s2 }
  0x11   :  { %v82_v4 = vld [vmem:[#allocation6 + $0x78] sm:$0xff]  ;;  %171 = vmatpush.msra.mxu3 %v87_v2  ;;  %v81_v9 = vld [vmem:[#allocation6 + $0x70] sm:$0xff]  ;;  %v84_v11 = vld [vmem:[#allocation8] sm:$0xff]  ;;  %130 = vmatpush.msra.mxu1 %v89_v10 }
  0x12   :  { %290 = vmatmul.msk.f32.vlgmr.msra.gmra.mxu3 %vm92_vm1, %v83_v3  ;;  %v78_v8 = vld [vmem:[#allocation6 + $0x58] sm:$0xff]  ;;  %151 = vmatpush.msra.mxu2 %v86_v6  ;;  %v85_v12 = vld [vmem:[#allocation8 + $0x8] sm:$0xff]  ;;  %v77_v14 = vld [vmem:[#allocation6 + $0x50] sm:$0xff] }
  0x13   :  { %252 = vmatpush.msrb.mxu3 %v82_v4  ;;  %v74_v13 = vld [vmem:[#allocation6 + $0x38] sm:$0xff]  ;;  %289 = vmatmul.msk.f32.vlgmr.msra.gmra.mxu2 %vm92_vm1, %v83_v3  ;;  %v73_v16 = vld [vmem:[#allocation6 + $0x30] sm:$0xff]  ;;  %v79_v18 = vld [vmem:[#allocation6 + $0x60] sm:$0xff] }
  0x14   :  { %232 = vmatpush.msrb.mxu2 %v81_v9  ;;  %v70_v15 = vld [vmem:[#allocation6 + $0x18] sm:$0xff]  ;;  %111 = vmatpush.msra.mxu0 %v84_v11  ;;  %v80_v19 = vld [vmem:[#allocation6 + $0x68] sm:$0xff]  ;;  %v69_v20 = vld [vmem:[#allocation6 + $0x10] sm:$0xff] }
  0x15   :  { %253 = vmatpush.msrb.mxu3 %v78_v8  ;;  %131 = vmatpush.msra.mxu1 %v85_v12  ;;  %v75_v21 = vld [vmem:[#allocation6 + $0x40] sm:$0xff]  ;;  %v76_v22 = vld [vmem:[#allocation6 + $0x48] sm:$0xff] }
  0x16   :  { %v66_v17 = vld [vmem:[#allocation2] sm:$0xff]  ;;  %233 = vmatpush.msrb.mxu2 %v77_v14  ;;  %287 = vmatmul.msk.f32.vlgmr.msra.gmra.mxu0 %vm92_vm1, %v83_v3  ;;  %v71_v23 = vld [vmem:[#allocation6 + $0x20] sm:$0xff]  ;;  %v72_v24 = vld [vmem:[#allocation6 + $0x28] sm:$0xff] }
  0x17   :  { %254 = vmatpush.msrb.mxu3 %v74_v13  ;;  %288 = vmatmul.msk.f32.vlgmr.msra.gmra.mxu1 %vm92_vm1, %v83_v3  ;;  %v67_v25 = vld [vmem:[#allocation6] sm:$0xff]  ;;  %v68_v26 = vld [vmem:[#allocation6 + $0x8] sm:$0xff] }
  0x18   :  { %234 = vmatpush.msrb.mxu2 %v73_v16  ;;  %192 = vmatpush.msrb.mxu0 %v79_v18 }
  0x19   :  { %255 = vmatpush.msrb.mxu3 %v70_v15  ;;  %212 = vmatpush.msrb.mxu1 %v80_v19 }
  0x1a   :  { %294 = vmatmul.msk.f32.vlgmr.msrb.gmra.mxu3 %vm64_vm0, %v66_v17  ;;  %235 = vmatpush.msrb.mxu2 %v69_v20 }
  0x1b   :  { %293 = vmatmul.msk.f32.vlgmr.msrb.gmra.mxu2 %vm64_vm0, %v66_v17  ;;  %193 = vmatpush.msrb.mxu0 %v75_v21 }
  0x1c   :  { %213 = vmatpush.msrb.mxu1 %v76_v22 }
  0x1d   :  { %194 = vmatpush.msrb.mxu0 %v71_v23 }
  0x1e   :  { %214 = vmatpush.msrb.mxu1 %v72_v24 }
  0x1f   :  { %195 = vmatpush.msrb.mxu0 %v67_v25 }
  0x20   :  { %215 = vmatpush.msrb.mxu1 %v68_v26  ;;  %291 = vmatmul.msk.f32.vlgmr.msrb.gmra.mxu0 %vm64_vm0, %v66_v17 }
  0x21   :  { %292 = vmatmul.msk.f32.vlgmr.msrb.gmra.mxu1 %vm64_vm0, %v66_v17 }
  0x93   :  { %v113_v28 = vpop.f32.mrf.mxu0 }
  0x94   :  { %v133_v29 = vpop.f32.mrf.mxu1 }
  0x95   :  { %v173_v27 = vpop.f32.mrf.mxu3 }
  0x96   :  { %v153_v30 = vpop.f32.mrf.mxu2 }
  0x9d   :  { %v257_v31 = vpop.f32.mrf.mxu3  ;;  %v197_v33 = vpop.f32.mrf.mxu0 }
  0x9e   :  { %v258_v32 = vadd.f32 %v257_v31, %v173_v27  ;;  %v198_v34 = vadd.f32 %v197_v33, %v113_v28  ;;  %v217_v35 = vpop.f32.mrf.mxu1  ;;  %v237_v36 = vpop.f32.mrf.mxu2 }
  0x9f   :  { %v218_v37 = vadd.f32 %v217_v35, %v133_v29  ;;  %v238_v38 = vadd.f32 %v237_v36, %v153_v30 }
  0xa0   :  { %263 = vst [vmem:[#allocation9 + $0x18] sm:$0xff] %v258_v32  ;;  %265 = vrot.lane.b32.xlu0 %v258_v32, %s406_s21 }
  0xa1   :  { %260 = vst [vmem:[#allocation9] sm:$0xff] %v198_v34 }
  0xa2   :  { %261 = vst [vmem:[#allocation9 + $0x8] sm:$0xff] %v218_v37 }
  0xa3   :  { %262 = vst [vmem:[#allocation9 + $0x10] sm:$0xff] %v238_v38 }
  0xa4   :  { %279 = dma.vmem_to_hbm [thread:$0]  %s275_s2, 512, %s277_s30, [#allocation5]  }
 0x112   :  { %v266_v39 = vpop.permute.xlu0 %265 }
 0x113   :  { %268 = vst.msk [vmem:[#allocation2] sm:$0xff] %vm64_vm0, %v266_v39 }
 0x114   :  { %402 = dma.done.wait [#allocation5], 512  }
 0x115   :  { %403 = vsyncadd [#allocation5], 4294966784 }
 0x116   :  { %284 = vsyncpa [#allocation4], 1 }
 0x117   :  { %285 = vsyncpa [#allocation7], 1 }
 0x118   :  { %286 = vsyncpa [#allocation5], 1 }

</bundles_post_ra>
